<compile_context>
chip_gen: v7x
topology: tpu7x:2x2x1
jax: 0.10.0
libtpu: 0.0.40
codegen_flags: <defaults>
</compile_context>

<pallas_src>
import jax
import jax.numpy as jnp
import numpy as np
from jax.experimental import pallas as pl
from jax.experimental.pallas import tpu as pltpu

_PAD_NORM = 1e30  # squared norm assigned to padded codebook entries


def _round_up(x, m):
    return ((x + m - 1) // m) * m


def _vmem_capacity_bytes():
    try:
        return int(pltpu.get_tpu_info().vmem_capacity_bytes)
    except Exception:  # not on TPU / API unavailable -> assume 128 MiB part
        return 128 * 1024 * 1024


def _select_tile_n(N, C_pad, d, vmem_limit_bytes, max_tile_n):
    """Pick the token-tile size (rows per grid step)."""
    # Per-row f32 bytes in flight: x tile (x2 buffers), dist block (x2 buffers),
    # plus ~3 (tile, C_pad) intermediates (xe / neg_d2 / sqrt temp).
    per_row = 4 * (2 * d + 5 * C_pad)
    resident = 4 * (C_pad * d + C_pad)          # codebook + squared norms
    avail = max(vmem_limit_bytes - resident, per_row * 128)
    cap_rows = max(128, avail // (2 * per_row))  # 2x safety margin
    tile_cap = max(128, (min(max_tile_n, cap_rows) // 128) * 128)

    if N <= min(256, max_tile_n):
        return _round_up(N, 8)                   # one small (8-aligned) tile
    # At least two 128-aligned tiles -> ("parallel",) grid can use both
    # TensorCores on v7x.
    half = _round_up(-(-N // 2), 128)
    return max(128, min(tile_cap, half))


def _make_kernel(write_dist):
    def kernel(x_ref, et_ref, sqe_ref, *out_refs):
        if write_dist:
            dist_ref, ind_ref = out_refs
        else:
            (ind_ref,) = out_refs

        x = x_ref[...]                                         # (TN, D)
        sq_x = jnp.sum(x * x, axis=-1, keepdims=True)          # (TN, 1)
        # Distance matmul on the MXU: canonical (M,K)x(K,N), codebook resident.
        xe = jnp.dot(x, et_ref[...],
                     preferred_element_type=jnp.float32)       # (TN, Cp)
        # Negative squared distance: monotone in -cdist, so the argmax is
        # identical but the EUP sqrt stays off the index critical path.
        neg_d2 = 2.0 * xe - sq_x - sqe_ref[...]                # (TN, Cp)

        if write_dist:
            # dist output = -cdist(..., p=2); stored before the argmax so its
            # vregs can retire early.
            dist_ref[...] = -jnp.sqrt(jnp.maximum(-neg_d2, 0.0))

        # Lane-dense index row for this tile.
        ind_ref[...] = jnp.argmax(neg_d2, axis=-1).astype(jnp.int32)[None, :]

    return kernel


def vector_quantize_forward(x, embed, *, max_tile_n=None, vmem_limit_bytes=None,
                            compute_dist=True):
    """Eval-mode VectorQuantize forward.

    x:     [b, n, d] (channel_last=True, heads=1)
    embed: [1, C, d] Euclidean codebook
    Returns (quantize, embed_ind, loss, dist, embed) like the torch module.
    With compute_dist=False, dist is None and its (N, C) HBM writeback is
    skipped entirely.
    """
    b, n, d = x.shape
    C = embed.shape[1]
    N = b * n

    # Match the torch codebook's x.float() / f32 buffers.
    flatten = x.reshape(N, d).astype(jnp.float32)
    e = embed[0].astype(jnp.float32)                           # (C, d)

    # Pad the codebook axis to a multiple of 128 (lane-dense dist stores, full
    # MXU N-dim). Padded entries get a huge squared norm so neg_d2 ~ -1e30 and
    # they never win the argmax; padded dist columns are sliced off below.
    C_pad = _round_up(C, 128)
    e_t = jnp.pad(e.T, ((0, 0), (0, C_pad - C)))               # (d, C_pad)
    sq_e = jnp.sum(e * e, axis=-1)                             # (C,)
    sq_e = jnp.pad(sq_e, (0, C_pad - C),
                   constant_values=_PAD_NORM)[None, :]         # (1, C_pad)

    # Generation-aware VMEM budget / tile caps (v7x: 64 MiB/TC; v5e/v6e: 128).
    vmem_cap = _vmem_capacity_bytes()
    if vmem_limit_bytes is None:
        vmem_limit_bytes = min(int(0.75 * vmem_cap), 100 * 1024 * 1024)
    if max_tile_n is None:
        max_tile_n = 256 if vmem_cap <= 64 * 1024 * 1024 else 1024

    tile_n = _select_tile_n(N, C_pad, d, vmem_limit_bytes, max_tile_n)
    n_pad = _round_up(N, tile_n)
    if n_pad != N:
        flatten = jnp.pad(flatten, ((0, n_pad - N), (0, 0)))
    num_tiles = n_pad // tile_n

    kernel = _make_kernel(compute_dist)

    def run(single_buffer_resident):
        # The codebook / sq-norm blocks never change across the grid; request
        # single buffering for them so they don't burn 2x VMEM.
        resident_kw = (dict(pipeline_mode=pl.Buffered(1))
                       if single_buffer_resident else {})
        in_specs = [
            pl.BlockSpec((tile_n, d), lambda i: (i, 0)),           # token tile
            pl.BlockSpec((d, C_pad), lambda i: (0, 0), **resident_kw),
            pl.BlockSpec((1, C_pad), lambda i: (0, 0), **resident_kw),
        ]
        out_shapes, out_specs = [], []
        if compute_dist:
            out_shapes.append(jax.ShapeDtypeStruct((n_pad, C_pad), jnp.float32))
            out_specs.append(pl.BlockSpec((tile_n, C_pad), lambda i: (i, 0)))
        out_shapes.append(jax.ShapeDtypeStruct((num_tiles, tile_n), jnp.int32))
        out_specs.append(pl.BlockSpec((1, tile_n), lambda i: (i, 0)))

        return pl.pallas_call(
            kernel,
            out_shape=tuple(out_shapes),
            grid_spec=pltpu.PrefetchScalarGridSpec(
                num_scalar_prefetch=0,
                grid=(num_tiles,),
                in_specs=in_specs,
                out_specs=out_specs,
            ),
            compiler_params=pltpu.CompilerParams(
                dimension_semantics=("parallel",),
                vmem_limit_bytes=vmem_limit_bytes,
            ),
        )(flatten, e_t, sq_e)

    try:
        outs = run(True)
    except Exception:
        # pipeline_mode=pl.Buffered(1) not supported by this jax/Mosaic build:
        # fall back to default double buffering (correctness unaffected).
        outs = run(False)

    if compute_dist:
        dist_full, ind = outs
        dist = dist_full[:N, :C].reshape(1, N, C)   # codebook returns [1, b*n, C]
    else:
        (ind,) = outs
        dist = None

    idx_flat = ind.reshape(-1)[:N]
    # quantize = embed[idx]: plain XLA gather in the wrapper (no second matmul).
    quantize = jnp.take(e, idx_flat, axis=0).reshape(b, n, d)   # project_out = Identity
    embed_ind = idx_flat.reshape(b, n)
    loss = jnp.array([0.0], dtype=jnp.float32)                  # eval mode: zero loss
    # TODO(synk): training-time EMA / kmeans init / commitment & orthogonal
    # losses are not executed in eval mode and are not implemented.
    # TODO(synk): `get_codes_from_indices` is computed in the torch forward but
    # its result is not part of the returned tuple; skipped here.
    # TODO(synk): for very large codebooks a second ("arbitrary") grid axis over
    # C-chunks with running-argmax scratch would be needed to fit v7x's 64 MiB.
    return quantize, embed_ind, loss, dist, embed


def _reference(x, embed):
    # Pure-JAX reference of the same eval-mode forward.
    b, n, d = x.shape
    flat = x.reshape(b * n, d).astype(jnp.float32)
    e = embed[0].astype(jnp.float32)
    d2 = (jnp.sum(flat ** 2, -1, keepdims=True)
          - 2.0 * flat @ e.T + jnp.sum(e ** 2, -1)[None, :])
    dist = -jnp.sqrt(jnp.maximum(d2, 0.0))
    idx = jnp.argmax(dist, -1)
    quant = e[idx].reshape(b, n, d)
    return quant, idx.reshape(b, n), dist.reshape(1, b * n, -1)


if __name__ == "__main__":
    key = jax.random.PRNGKey(0)

    def make_inputs(k, b, n, dim, codebook_size):
        kx, ke = jax.random.split(k)
        xv = jax.random.normal(kx, (b, n, dim), dtype=jnp.float32)
        # Deterministic stand-in for uniform_init (kaiming-uniform) codebook.
        bound = float(np.sqrt(6.0 / (codebook_size * dim)))
        ev = jax.random.uniform(ke, (1, codebook_size, dim),
                                minval=-bound, maxval=bound, dtype=jnp.float32)
        return xv, ev

    def check(xv, ev, **kw):
        out = vector_quantize_forward(xv, ev, **kw)
        quantize, embed_ind, loss, dist, embed_out = jax.block_until_ready(out)
        q_ref, i_ref, d_ref = _reference(xv, ev)
        b, n, dim = xv.shape
        C = ev.shape[1]
        assert np.array_equal(np.asarray(embed_ind), np.asarray(i_ref))
        assert np.allclose(np.asarray(quantize), np.asarray(q_ref), atol=1e-5)
        assert np.allclose(np.asarray(dist), np.asarray(d_ref), atol=1e-4)
        assert quantize.shape == (b, n, dim) and embed_ind.shape == (b, n)
        assert loss.shape == (1,) and dist.shape == (1, b * n, C)

    k0, k1, k2 = jax.random.split(key, 3)
    check(*make_inputs(k0, 2, 8, 32, 16))                    # single small tile (C padded to 128)
    check(*make_inputs(k1, 2, 5, 32, 16))                    # padded tail rows
    check(*make_inputs(k2, 2, 80, 32, 16), max_tile_n=128)   # multi-tile grid

    # dist-free fast path (skips the dominant (N, C) HBM writeback).
    xv, ev = make_inputs(k0, 2, 8, 32, 16)
    q2, i2, l2, d2, _ = jax.block_until_ready(
        vector_quantize_forward(xv, ev, compute_dist=False))
    q_ref, i_ref, _ = _reference(xv, ev)
    assert d2 is None
    assert np.array_equal(np.asarray(i2), np.asarray(i_ref))
    assert np.allclose(np.asarray(q2), np.asarray(q_ref), atol=1e-5)

    print("KERNEL_OK")
</pallas_src>

<mosaic_0001>
module attributes {stable_mosaic.version = 11 : i64} {
  func.func @kernel(%arg0: i32, %arg1: memref<16x32xf32, #tpu.memory_space<vmem>>, %arg2: memref<32x128xf32, #tpu.memory_space<vmem>>, %arg3: memref<1x128xf32, #tpu.memory_space<vmem>>, %arg4: memref<16x128xf32, #tpu.memory_space<vmem>>, %arg5: memref<1x16xi32, #tpu.memory_space<vmem>>) attributes {dimension_semantics = [#tpu.dimension_semantics<parallel>], iteration_bounds = array<i64: 1>, scalar_prefetch = 0 : i64, scratch_operands = 0 : i64, tpu.core_type = #tpu.core_type<tc>, window_params = [{transform_indices = @transform_0, window_bounds = array<i64: 16, 32>}, {pipeline_mode = #tpu.pipeline_mode<synchronous>, transform_indices = @transform_1, window_bounds = array<i64: 32, 128>}, {pipeline_mode = #tpu.pipeline_mode<synchronous>, transform_indices = @transform_2, window_bounds = array<i64: 1, 128>}, {transform_indices = @transform_3, window_bounds = array<i64: 16, 128>}, {transform_indices = @transform_4, window_bounds = array<i64: 1, 16>}]} {
    %c0 = arith.constant 0 : index
    %c0_0 = arith.constant 0 : index
    %0 = vector.load %arg1[%c0, %c0_0] : memref<16x32xf32, #tpu.memory_space<vmem>>, vector<16x32xf32>
    %1 = arith.mulf %0, %0 : vector<16x32xf32>
    %cst = arith.constant dense<0.000000e+00> : vector<16xf32>
    %2 = vector.multi_reduction <add>, %1, %cst [1] : vector<16x32xf32> to vector<16xf32>
    %3 = vector.shape_cast %2 : vector<16xf32> to vector<16x1xf32>
    %c0_1 = arith.constant 0 : index
    %c0_2 = arith.constant 0 : index
    %4 = vector.load %arg2[%c0_1, %c0_2] : memref<32x128xf32, #tpu.memory_space<vmem>>, vector<32x128xf32>
    %cst_3 = arith.constant dense<0.000000e+00> : vector<16x128xf32>
    %5 = tpu.matmul %0, %4, %cst_3 {dimension_numbers = #tpu.dot_dimension_numbers<[1], [0], [0], [1], [0, 0, 1, 1], [], []>} : vector<16x32xf32>, vector<32x128xf32>, vector<16x128xf32> -> vector<16x128xf32>
    %cst_4 = arith.constant 2.000000e+00 : f32
    %6 = vector.broadcast %cst_4 : f32 to vector<16x128xf32>
    %7 = arith.mulf %6, %5 : vector<16x128xf32>
    %8 = vector.broadcast %3 : vector<16x1xf32> to vector<16x128xf32>
    %9 = arith.subf %7, %8 : vector<16x128xf32>
    %c0_5 = arith.constant 0 : index
    %c0_6 = arith.constant 0 : index
    %10 = vector.load %arg3[%c0_5, %c0_6] : memref<1x128xf32, #tpu.memory_space<vmem>>, vector<1x128xf32>
    %11 = vector.broadcast %10 : vector<1x128xf32> to vector<16x128xf32>
    %12 = arith.subf %9, %11 : vector<16x128xf32>
    %cst_7 = arith.constant 0.000000e+00 : f32
    %13 = vector.broadcast %cst_7 : f32 to vector<16x128xf32>
    %14 = arith.subf %13, %12 : vector<16x128xf32>
    %cst_8 = arith.constant 0.000000e+00 : f32
    %15 = vector.broadcast %cst_8 : f32 to vector<16x128xf32>
    %16 = arith.maximumf %14, %15 : vector<16x128xf32>
    %17 = math.sqrt %16 : vector<16x128xf32>
    %cst_9 = arith.constant 0.000000e+00 : f32
    %18 = vector.broadcast %cst_9 : f32 to vector<16x128xf32>
    %19 = arith.subf %18, %17 : vector<16x128xf32>
    %c0_10 = arith.constant 0 : index
    %c0_11 = arith.constant 0 : index
    %20 = vector.load %arg4[%c0_10, %c0_11] : memref<16x128xf32, #tpu.memory_space<vmem>>, vector<16x128xf32>
    tpu.vector_store %arg4[%c0_10, %c0_11], %19 {strides = array<i32>} : memref<16x128xf32, #tpu.memory_space<vmem>>, vector<16x128xf32>,
    %21 = tpu.reduce_index %12 {axis = 1 : i32, kind = #tpu.reduction_kind<arg_max>} : vector<16x128xf32> -> vector<16xi32>
    %22 = vector.shape_cast %21 : vector<16xi32> to vector<1x16xi32>
    %c0_12 = arith.constant 0 : index
    %c0_13 = arith.constant 0 : index
    %23 = vector.load %arg5[%c0_12, %c0_13] : memref<1x16xi32, #tpu.memory_space<vmem>>, vector<1x16xi32>
    tpu.vector_store %arg5[%c0_12, %c0_13], %22 {strides = array<i32>} : memref<1x16xi32, #tpu.memory_space<vmem>>, vector<1x16xi32>,
    return
  }
  func.func @transform_0(%arg0: i32) -> (i32, i32) {
    %c0_i32 = arith.constant 0 : i32
    %c0_i32_0 = arith.constant 0 : i32
    return %arg0, %c0_i32 : i32, i32
  }
  func.func @transform_1(%arg0: i32) -> (i32, i32) {
    %c0_i32 = arith.constant 0 : i32
    %c0_i32_0 = arith.constant 0 : i32
    %c0_i32_1 = arith.constant 0 : i32
    return %c0_i32, %c0_i32_0 : i32, i32
  }
  func.func @transform_2(%arg0: i32) -> (i32, i32) {
    %c0_i32 = arith.constant 0 : i32
    %c0_i32_0 = arith.constant 0 : i32
    %c0_i32_1 = arith.constant 0 : i32
    return %c0_i32, %c0_i32_0 : i32, i32
  }
  func.func @transform_3(%arg0: i32) -> (i32, i32) {
    %c0_i32 = arith.constant 0 : i32
    %c0_i32_0 = arith.constant 0 : i32
    return %arg0, %c0_i32 : i32, i32
  }
  func.func @transform_4(%arg0: i32) -> (i32, i32) {
    %c0_i32 = arith.constant 0 : i32
    %c0_i32_0 = arith.constant 0 : i32
    return %arg0, %c0_i32 : i32, i32
  }
}

module attributes {stable_mosaic.version = 11 : i64} {
  func.func @kernel(%arg0: i32, %arg1: memref<16x32xf32, #tpu.memory_space<vmem>>, %arg2: memref<32x128xf32, #tpu.memory_space<vmem>>, %arg3: memref<1x128xf32, #tpu.memory_space<vmem>>, %arg4: memref<16x128xf32, #tpu.memory_space<vmem>>, %arg5: memref<1x16xi32, #tpu.memory_space<vmem>>) attributes {dimension_semantics = [#tpu.dimension_semantics<parallel>], iteration_bounds = array<i64: 1>, scalar_prefetch = 0 : i64, scratch_operands = 0 : i64, tpu.core_type = #tpu.core_type<tc>, window_params = [{transform_indices = @transform_0, window_bounds = array<i64: 16, 32>}, {pipeline_mode = #tpu.pipeline_mode<synchronous>, transform_indices = @transform_1, window_bounds = array<i64: 32, 128>}, {pipeline_mode = #tpu.pipeline_mode<synchronous>, transform_indices = @transform_2, window_bounds = array<i64: 1, 128>}, {transform_indices = @transform_3, window_bounds = array<i64: 16, 128>}, {transform_indices = @transform_4, window_bounds = array<i64: 1, 16>}]} {
    %c0 = arith.constant 0 : index
    %c0_0 = arith.constant 0 : index
    %0 = vector.load %arg1[%c0, %c0_0] : memref<16x32xf32, #tpu.memory_space<vmem>>, vector<16x32xf32>
    %1 = arith.mulf %0, %0 : vector<16x32xf32>
    %cst = arith.constant dense<0.000000e+00> : vector<16xf32>
    %2 = vector.multi_reduction <add>, %1, %cst [1] : vector<16x32xf32> to vector<16xf32>
    %3 = vector.shape_cast %2 : vector<16xf32> to vector<16x1xf32>
    %c0_1 = arith.constant 0 : index
    %c0_2 = arith.constant 0 : index
    %4 = vector.load %arg2[%c0_1, %c0_2] : memref<32x128xf32, #tpu.memory_space<vmem>>, vector<32x128xf32>
    %cst_3 = arith.constant dense<0.000000e+00> : vector<16x128xf32>
    %5 = tpu.matmul %0, %4, %cst_3 {dimension_numbers = #tpu.dot_dimension_numbers<[1], [0], [0], [1], [0, 0, 1, 1], [], []>} : vector<16x32xf32>, vector<32x128xf32>, vector<16x128xf32> -> vector<16x128xf32>
    %cst_4 = arith.constant 2.000000e+00 : f32
    %6 = vector.broadcast %cst_4 : f32 to vector<16x128xf32>
    %7 = arith.mulf %6, %5 : vector<16x128xf32>
    %8 = vector.broadcast %3 : vector<16x1xf32> to vector<16x128xf32>
    %9 = arith.subf %7, %8 : vector<16x128xf32>
    %c0_5 = arith.constant 0 : index
    %c0_6 = arith.constant 0 : index
    %10 = vector.load %arg3[%c0_5, %c0_6] : memref<1x128xf32, #tpu.memory_space<vmem>>, vector<1x128xf32>
    %11 = vector.broadcast %10 : vector<1x128xf32> to vector<16x128xf32>
    %12 = arith.subf %9, %11 : vector<16x128xf32>
    %cst_7 = arith.constant 0.000000e+00 : f32
    %13 = vector.broadcast %cst_7 : f32 to vector<16x128xf32>
    %14 = arith.subf %13, %12 : vector<16x128xf32>
    %cst_8 = arith.constant 0.000000e+00 : f32
    %15 = vector.broadcast %cst_8 : f32 to vector<16x128xf32>
    %16 = arith.maximumf %14, %15 : vector<16x128xf32>
    %17 = math.sqrt %16 : vector<16x128xf32>
    %cst_9 = arith.constant 0.000000e+00 : f32
    %18 = vector.broadcast %cst_9 : f32 to vector<16x128xf32>
    %19 = arith.subf %18, %17 : vector<16x128xf32>
    %c0_10 = arith.constant 0 : index
    %c0_11 = arith.constant 0 : index
    %20 = vector.load %arg4[%c0_10, %c0_11] : memref<16x128xf32, #tpu.memory_space<vmem>>, vector<16x128xf32>
    tpu.vector_store %arg4[%c0_10, %c0_11], %19 {strides = array<i32>} : memref<16x128xf32, #tpu.memory_space<vmem>>, vector<16x128xf32>,
    %21 = tpu.reduce_index %12 {axis = 1 : i32, kind = #tpu.reduction_kind<arg_max>} : vector<16x128xf32> -> vector<16xi32>
    %22 = vector.shape_cast %21 : vector<16xi32> to vector<1x16xi32>
    %c0_12 = arith.constant 0 : index
    %c0_13 = arith.constant 0 : index
    %23 = vector.load %arg5[%c0_12, %c0_13] : memref<1x16xi32, #tpu.memory_space<vmem>>, vector<1x16xi32>
    tpu.vector_store %arg5[%c0_12, %c0_13], %22 {strides = array<i32>} : memref<1x16xi32, #tpu.memory_space<vmem>>, vector<1x16xi32>,
    return
  }
  func.func @transform_0(%arg0: i32) -> (i32, i32) {
    %c0_i32 = arith.constant 0 : i32
    %c0_i32_0 = arith.constant 0 : i32
    return %arg0, %c0_i32 : i32, i32
  }
  func.func @transform_1(%arg0: i32) -> (i32, i32) {
    %c0_i32 = arith.constant 0 : i32
    %c0_i32_0 = arith.constant 0 : i32
    %c0_i32_1 = arith.constant 0 : i32
    return %c0_i32, %c0_i32_0 : i32, i32
  }
  func.func @transform_2(%arg0: i32) -> (i32, i32) {
    %c0_i32 = arith.constant 0 : i32
    %c0_i32_0 = arith.constant 0 : i32
    %c0_i32_1 = arith.constant 0 : i32
    return %c0_i32, %c0_i32_0 : i32, i32
  }
  func.func @transform_3(%arg0: i32) -> (i32, i32) {
    %c0_i32 = arith.constant 0 : i32
    %c0_i32_0 = arith.constant 0 : i32
    return %arg0, %c0_i32 : i32, i32
  }
  func.func @transform_4(%arg0: i32) -> (i32, i32) {
    %c0_i32 = arith.constant 0 : i32
    %c0_i32_0 = arith.constant 0 : i32
    return %arg0, %c0_i32 : i32, i32
  }
}

</mosaic_0001>

<bundles_post_ra>
// kernel: tpu_custom_call.1
= control target key start
LH: loop header
LB: loop body
LE: loop exit
PB: predicated region body
PF: predicated region fallthrough
CT: control target
= control target key end

     0   :  { %10 = vsyncpa [#allocation3], 0  ;;  %s508_s0 = inlined_call_operand.hbm [shape: f32[16,32], index: 0, kind: input, shape index: {}]   ;;  %s509_s1 = inlined_call_operand.hbm [shape: f32[32,128], index: 1, kind: input, shape index: {}]   ;;  %s510_s2 = inlined_call_operand.hbm [shape: f32[1,128], index: 2, kind: input, shape index: {}]   ;;  %s511_s3 = inlined_call_operand.hbm [shape: f32[16,128], index: 3, kind: output, shape index: {0}]   ;;  %s512_s4 = inlined_call_operand.hbm [shape: s32[1,16], index: 4, kind: output, shape index: {1}]  }
   0x1   :  { %11 = vsyncpa [#allocation6], 0 }
   0x2   :  { %12 = vsyncpa [#allocation4], 0 }
   0x3   :  { %13 = vsyncpa [#allocation10], 0  ;;  %s396_s15 = smov [#allocation5]   ;;  %s397_s17 = smov [#allocation2]  }
   0x4   :  { %s31_s16 = sshll.u32 %s396_s15, 4  ;;  %s19_s18 = sshll.u32 %s397_s17, 4  ;;  %s32_s16 = int_to_ptr.vmem [resolvable:$true] %s31_s16  ;;  %s428_s18 = int_to_ptr.vmem [resolvable:$true] %s19_s18 }
   0x5   :  { %s278_s21 = scalar_lea.hbm %s509_s1, 512 }
   0x6   :  { %p279_p0 = scmp.ne.s32.totalorder %s509_s1, %s278_s21  ;;  %p282_p1 = scmp.lt.u32.totalorder %s278_s21, %s509_s1 }
   0x8   :  { %p284_p2 = pnand %p282_p1, %p279_p0 }
   0xa   :  { %287 = shalt.err (!%p284_p2)
}
   0xb   :  { %s288_s26 = scalar_lea.vmem %s32_s16, 512  ;;  %p293_p4 = scmp.lt.s32.totalorder %s32_s16, %s32_s16 }
   0xc   :  { %p289_p3 = scmp.ne.s32.totalorder %s32_s16, %s288_s26  ;;  %p294_p5 = scmp.lt.s32.totalorder %s288_s26, %s288_s26 }
   0xe   :  { %p295_p6 = por %p294_p5, %p293_p4 }
  0x10   :  { %p296_p7 = pnand %p295_p6, %p289_p3 }
  0x12   :  { %299 = shalt.err (!%p296_p7)
}
  0x13   :  { %s398_s27 = smov 128   ;;  %s399_s28 = smov 8  }
  0x14   :  { %37 = dma.hbm_to_vmem [thread:$0]  %s509_s1, 512, %s32_s16, [#allocation6], %s398_s27, %s398_s27, %s399_s28  }
  0x15   :  { %s300_s7 = scalar_lea.hbm %s508_s0, 256 }
  0x16   :  { %p301_p8 = scmp.ne.s32.totalorder %s508_s0, %s300_s7  ;;  %p304_p9 = scmp.lt.u32.totalorder %s300_s7, %s508_s0 }
  0x18   :  { %p306_p10 = pnand %p304_p9, %p301_p8 }
  0x1a   :  { %309 = shalt.err (!%p306_p10)
}
  0x1b   :  { %s310_s12 = scalar_lea.vmem %s428_s18, 256  ;;  %p315_p12 = scmp.lt.s32.totalorder %s428_s18, %s428_s18 }
  0x1c   :  { %p311_p11 = scmp.ne.s32.totalorder %s428_s18, %s310_s12  ;;  %p316_p13 = scmp.lt.s32.totalorder %s310_s12, %s310_s12 }
  0x1e   :  { %p317_p0 = por %p316_p13, %p315_p12 }
  0x20   :  { %p318_p1 = pnand %p317_p0, %p311_p11 }
  0x22   :  { %321 = shalt.err (!%p318_p1)
}
  0x23   :  { %25 = dma.hbm_to_vmem [thread:$0]  %s508_s0, 256, %s428_s18, [#allocation3], %s398_s27, %s398_s27, %s399_s28  }
  0x24   :  { %s400_s14 = smov [#allocation7]   ;;  %s322_s19 = scalar_lea.hbm %s510_s2, 16 }
  0x25   :  { %s44_s15 = sshll.u32 %s400_s14, 4  ;;  %p323_p2 = scmp.ne.s32.totalorder %s510_s2, %s322_s19  ;;  %s45_s15 = int_to_ptr.vmem [resolvable:$true] %s44_s15 }
  0x26   :  { %p326_p3 = scmp.lt.u32.totalorder %s322_s19, %s510_s2 }
  0x28   :  { %p328_p4 = pnand %p326_p3, %p323_p2 }
  0x2a   :  { %331 = shalt.err (!%p328_p4)
}
  0x2b   :  { %s332_s24 = scalar_lea.vmem %s45_s15, 16  ;;  %s336_s0 = scalar_lea.vmem %s45_s15, 32 }
  0x2c   :  { %p333_p5 = scmp.ne.s32.totalorder %s45_s15, %s332_s24  ;;  %p337_p6 = scmp.lt.s32.totalorder %s45_s15, %s45_s15 }
  0x2d   :  { %p338_p7 = scmp.lt.s32.totalorder %s336_s0, %s332_s24 }
  0x2f   :  { %p339_p8 = por %p338_p7, %p337_p6 }
  0x31   :  { %p340_p9 = pnand %p339_p8, %p333_p5 }
  0x33   :  { %343 = shalt.err (!%p340_p9)
}
  0x34   :  { %47 = dma.hbm_to_vmem [thread:$0]  %s510_s2, 16, %s45_s15, [#allocation6]  }
  0x35   :  { %388 = dma.done.wait [#allocation3], 256  }
  0x36   :  { %389 = vsyncadd [#allocation3], 4294967040 }
  0x37   :  { %390 = dma.done.wait [#allocation6], 528  }
  0x38   :  { %391 = vsyncadd [#allocation6], 4294966768  ;;  %vm61_vm0 = vcmask 261120   ;;  %v68_v0 = vld [vmem:[#allocation5] sm:$0xff]  ;;  %v69_v1 = vld [vmem:[#allocation5 + $0x8] sm:$0xff]  ;;  %s401_s2 = smov [#allocation8]  }
  0x39   :  { %v70_v2 = vld [vmem:[#allocation5 + $0x10] sm:$0xff]  ;;  %v259_v3 = vpack.c.bf16 %v69_v1, %v68_v0  ;;  %v71_v4 = vld [vmem:[#allocation5 + $0x18] sm:$0xff]  ;;  %v241_v18 = vld [vmem:[#allocation7] ss:$0 sm:$0xff]  ;;  %s212_s26 = sshll.u32 %s401_s2, 4  ;;  %s213_s26 = int_to_ptr.vmem [resolvable:$true] %s212_s26 }
  0x3a   :  { %v57_v5 = vld [vmem:[#allocation2] sm:$0xff]  ;;  %v58_v6 = vld [vmem:[#allocation2 + $0x8] sm:$0xff]  ;;  %v263_v7 = vpack.c.bf16 %v71_v4, %v70_v2  ;;  %s344_s29 = scalar_lea.vmem %s213_s26, 256  ;;  %p349_p11 = scmp.lt.s32.totalorder %s213_s26, %s213_s26 }
  0x3b   :  { %v59_v8 = vmul.f32 %v57_v5, %v57_v5  ;;  %256 = vmatprep.mubr.msk.f32.mxu0 %vm61_vm0, %v57_v5  ;;  %v60_v9 = vmul.f32 %v58_v6, %v58_v6  ;;  %260 = vmatprep.subr.bf16.mxu0 %v259_v3  ;;  %p345_p10 = scmp.ne.s32.totalorder %s213_s26, %s344_s29  ;;  %p350_p12 = scmp.lt.s32.totalorder %s344_s29, %s344_s29 }
  0x3c   :  { %262 = vmatpush3.bf16.msra.mxu0 %v259_v3 }
  0x3d   :  { %v62_v10 = vsel %vm61_vm0, %v59_v8, 0.0  ;;  %264 = vmatprep.subr.bf16.mxu0 %v263_v7  ;;  %v65_v11 = vsel %vm61_vm0, %v60_v9, 0.0  ;;  %p351_p13 = por %p350_p12, %p349_p11 }
  0x3e   :  { %63 = vadd.xlane.f32.xlu0 %v62_v10 }
  0x3f   :  { %p352_p0 = pnand %p351_p13, %p345_p10 }
  0x40   :  { %266 = vmatpush3.bf16.msra.mxu0 %v263_v7 }
  0x42   :  { %66 = vadd.xlane.f32.xlu0 %v65_v11 }
  0x43   :  { %257 = vmatmul.mubr.msk.f32.vlgmr.msra.gmra.mrb[0].mxu0 %vm61_vm0, %v58_v6 }
  0xcb   :  { %v64_v12 = vpop.xlane.xlu0 %63 }
  0xcf   :  { %v67_v14 = vpop.xlane.xlu0 %66 }
 0x116   :  { %v258_v13 = vpop.f32.mrb[0].mxu0 }
 0x117   :  { %v154_v15 = vmul.f32 2.0, %v258_v13  ;;  %v144_v16 = vpop.f32.mrb[1].mxu0 }
 0x118   :  { %v153_v17 = vmul.f32 2.0, %v144_v16 }
 0x119   :  { %v156_v19 = vsub.f32 %v154_v15, %v67_v14 }
 0x11a   :  { %v155_v20 = vsub.f32 %v153_v17, %v64_v12 }
 0x11b   :  { %v165_v21 = vsub.f32 %v156_v19, %v241_v18 }
 0x11c   :  { %v164_v22 = vsub.f32 %v155_v20, %v241_v18 }
 0x11d   :  { %v167_v23 = vsub.f32 0.0, %v165_v21 }
 0x11e   :  { %188 = vmax.index.xlane.f32.xlu1 %v164_v22  ;;  %v166_v24 = vsub.f32 0.0, %v164_v22 }
 0x11f   :  { %v169_v25 = vmax.f32 %v167_v23, 0.0 }
 0x120   :  { %v168_v26 = vmax.f32 %v166_v24, 0.0 }
 0x121   :  { %274 = vrsqrt.f32 %v169_v25  ;;  %vm179_vm1 = vcmp.eq.f32.partialorder %v169_v25, inf  ;;  %v182_v31 = vand.u32 2147483648, %v169_v25  ;;  %vm181_vm3 = vcmp.eq.f32.partialorder %v169_v25, 0.0 }
 0x122   :  { %276 = vrsqrt.f32 %v168_v26  ;;  %190 = vmax.index.xlane.f32.xlu1 %v165_v21  ;;  %vm172_vm2 = vcmp.eq.f32.partialorder %v168_v26, inf  ;;  %v175_v32 = vand.u32 2147483648, %v168_v26  ;;  %vm174_vm4 = vcmp.eq.f32.partialorder %v168_v26, 0.0 }
 0x12b   :  { %v275_v27 = vpop.eup %274 }
 0x12c   :  { %v277_v28 = vpop.eup %276  ;;  %v178_v29 = vmul.f32 %v275_v27, %v169_v25 }
 0x12d   :  { %v171_v30 = vmul.f32 %v277_v28, %v168_v26 }
 0x12e   :  { %v180_v33 = vsel %vm179_vm1, %v169_v25, %v178_v29 }
 0x12f   :  { %v173_v34 = vsel %vm172_vm2, %v168_v26, %v171_v30  ;;  %v183_v35 = vsel %vm181_vm3, %v182_v31, %v180_v33 }
 0x130   :  { %v176_v36 = vsel %vm174_vm4, %v175_v32, %v173_v34  ;;  %v185_v37 = vsub.f32 0.0, %v183_v35 }
 0x131   :  { %v184_v38 = vsub.f32 0.0, %v176_v36 }
 0x132   :  { %187 = vst [vmem:[#allocation8 + $0x8] sm:$0xff] %v185_v37 }
 0x133   :  { %186 = vst [vmem:[#allocation8] sm:$0xff] %v184_v38 }
 0x134   :  { %355 = shalt.err (!%p352_p0)
}
 0x135   :  { %s356_s6 = scalar_lea.hbm %s511_s3, 256 }
 0x136   :  { %p357_p1 = scmp.ne.s32.totalorder %s511_s3, %s356_s6  ;;  %p360_p2 = scmp.lt.u32.totalorder %s356_s6, %s511_s3 }
 0x138   :  { %p362_p3 = pnand %p360_p2, %p357_p1 }
 0x13a   :  { %365 = shalt.err (!%p362_p3)
}
 0x13b   :  { %218 = dma.vmem_to_hbm [thread:$0]  %s213_s26, 256, %s511_s3, [#allocation4], %s398_s27, %s398_s27, %s399_s28   ;;  %v192_v39 = vlaneseq  ;;  %vm203_vm5 = vcmask 130112   ;;  %vm205_vm6 = vcmask 122880  }
 0x13c   :  { %s402_s1 = smov [#allocation9]  }
 0x13d   :  { %v193_v40 = vand.u32 127, %v192_v39  ;;  %v195_v41 = vshrl.u32 %v192_v39, 7  ;;  %s225_s13 = sshll.u32 %s402_s1, 4  ;;  %s226_s13 = int_to_ptr.vmem [resolvable:$true] %s225_s13 }
 0x13e   :  { %s366_s14 = scalar_lea.vmem %s226_s13, 16  ;;  %s370_s3 = scalar_lea.vmem %s226_s13, 32 }
 0x13f   :  { %v198_v42 = vadd.s32 4294967288, %v193_v40  ;;  %v196_v44 = vsub.s32 %v193_v40, %v195_v41  ;;  %p367_p4 = scmp.ne.s32.totalorder %s226_s13, %s366_s14  ;;  %p371_p5 = scmp.lt.s32.totalorder %s226_s13, %s226_s13 }
 0x140   :  { %p372_p6 = scmp.lt.s32.totalorder %s370_s3, %s366_s14 }
 0x141   :  { %v201_v45 = vsub.s32 %v198_v42, %v195_v41 }
 0x142   :  { %p373_p7 = por %p372_p6, %p371_p5 }
 0x144   :  { %p374_p8 = pnand %p373_p7, %p367_p4 }
 0x1ab   :  { %v189_v43 = vpop.xlane.xlu1 %188 }
 0x1ac   :  { %v197_v47 = vrot.slane %v189_v43, %v196_v44 }
 0x1af   :  { %v191_v46 = vpop.xlane.xlu1 %190 }
 0x1b0   :  { %v202_v48 = vrot.slane %v191_v46, %v201_v45 }
 0x1b2   :  { %v204_v49 = vsel %vm203_vm5, %v202_v48, %v197_v47 }
 0x1b3   :  { %206 = vst.msk [vmem:[#allocation9] sm:$0x1] %vm205_vm6, %v204_v49 }
 0x1b4   :  { %377 = shalt.err (!%p374_p8)
}
 0x1b5   :  { %s378_s15 = scalar_lea.hbm %s512_s4, 16 }
 0x1b6   :  { %p379_p9 = scmp.ne.s32.totalorder %s512_s4, %s378_s15  ;;  %p382_p10 = scmp.lt.u32.totalorder %s378_s15, %s512_s4 }
 0x1b8   :  { %p384_p11 = pnand %p382_p10, %p379_p9 }
 0x1ba   :  { %387 = shalt.err (!%p384_p11)
}
 0x1bb   :  { %228 = dma.vmem_to_hbm [thread:$0]  %s226_s13, 16, %s512_s4, [#allocation10]  }
 0x1bc   :  { %392 = dma.done.wait [#allocation4], 256  }
 0x1bd   :  { %393 = vsyncadd [#allocation4], 4294967040 }
 0x1be   :  { %394 = dma.done.wait [#allocation10], 16  }
 0x1bf   :  { %395 = vsyncadd [#allocation10], 4294967280 }
 0x1c0   :  { %235 = vsyncpa [#allocation3], 1 }
 0x1c1   :  { %236 = vsyncpa [#allocation6], 1 }
 0x1c2   :  { %237 = vsyncpa [#allocation4], 1 }
 0x1c3   :  { %238 = vsyncpa [#allocation10], 1 }

// kernel: tpu_custom_call.1
= control target key start
LH: loop header
LB: loop body
LE: loop exit
PB: predicated region body
PF: predicated region fallthrough
CT: control target
= control target key end

     0   :  { %10 = vsyncpa [#allocation3], 0  ;;  %s508_s0 = inlined_call_operand.hbm [shape: f32[16,32], index: 0, kind: input, shape index: {}]   ;;  %s509_s1 = inlined_call_operand.hbm [shape: f32[32,128], index: 1, kind: input, shape index: {}]   ;;  %s510_s2 = inlined_call_operand.hbm [shape: f32[1,128], index: 2, kind: input, shape index: {}]   ;;  %s511_s3 = inlined_call_operand.hbm [shape: f32[16,128], index: 3, kind: output, shape index: {0}]   ;;  %s512_s4 = inlined_call_operand.hbm [shape: s32[1,16], index: 4, kind: output, shape index: {1}]  }
   0x1   :  { %11 = vsyncpa [#allocation6], 0 }
   0x2   :  { %12 = vsyncpa [#allocation4], 0 }
   0x3   :  { %13 = vsyncpa [#allocation10], 0  ;;  %s396_s15 = smov [#allocation5]   ;;  %s397_s17 = smov [#allocation2]  }
   0x4   :  { %s31_s16 = sshll.u32 %s396_s15, 4  ;;  %s19_s18 = sshll.u32 %s397_s17, 4  ;;  %s32_s16 = int_to_ptr.vmem [resolvable:$true] %s31_s16  ;;  %s428_s18 = int_to_ptr.vmem [resolvable:$true] %s19_s18 }
   0x5   :  { %s278_s21 = scalar_lea.hbm %s509_s1, 512 }
   0x6   :  { %p279_p0 = scmp.ne.s32.totalorder %s509_s1, %s278_s21  ;;  %p282_p1 = scmp.lt.u32.totalorder %s278_s21, %s509_s1 }
   0x8   :  { %p284_p2 = pnand %p282_p1, %p279_p0 }
   0xa   :  { %287 = shalt.err (!%p284_p2)
}
   0xb   :  { %s288_s26 = scalar_lea.vmem %s32_s16, 512  ;;  %p293_p4 = scmp.lt.s32.totalorder %s32_s16, %s32_s16 }
   0xc   :  { %p289_p3 = scmp.ne.s32.totalorder %s32_s16, %s288_s26  ;;  %p294_p5 = scmp.lt.s32.totalorder %s288_s26, %s288_s26 }
   0xe   :  { %p295_p6 = por %p294_p5, %p293_p4 }
  0x10   :  { %p296_p7 = pnand %p295_p6, %p289_p3 }
  0x12   :  { %299 = shalt.err (!%p296_p7)
}
  0x13   :  { %s398_s27 = smov 128   ;;  %s399_s28 = smov 8  }
  0x14   :  { %37 = dma.hbm_to_vmem [thread:$0]  %s509_s1, 512, %s32_s16, [#allocation6], %s398_s27, %s398_s27, %s399_s28  }
  0x15   :  { %s300_s7 = scalar_lea.hbm %s508_s0, 256 }
  0x16   :  { %p301_p8 = scmp.ne.s32.totalorder %s508_s0, %s300_s7  ;;  %p304_p9 = scmp.lt.u32.totalorder %s300_s7, %s508_s0 }
  0x18   :  { %p306_p10 = pnand %p304_p9, %p301_p8 }
  0x1a   :  { %309 = shalt.err (!%p306_p10)
}
  0x1b   :  { %s310_s12 = scalar_lea.vmem %s428_s18, 256  ;;  %p315_p12 = scmp.lt.s32.totalorder %s428_s18, %s428_s18 }
  0x1c   :  { %p311_p11 = scmp.ne.s32.totalorder %s428_s18, %s310_s12  ;;  %p316_p13 = scmp.lt.s32.totalorder %s310_s12, %s310_s12 }
  0x1e   :  { %p317_p0 = por %p316_p13, %p315_p12 }
  0x20   :  { %p318_p1 = pnand %p317_p0, %p311_p11 }
  0x22   :  { %321 = shalt.err (!%p318_p1)
}
  0x23   :  { %25 = dma.hbm_to_vmem [thread:$0]  %s508_s0, 256, %s428_s18, [#allocation3], %s398_s27, %s398_s27, %s399_s28  }
  0x24   :  { %s400_s14 = smov [#allocation7]   ;;  %s322_s19 = scalar_lea.hbm %s510_s2, 16 }
  0x25   :  { %s44_s15 = sshll.u32 %s400_s14, 4  ;;  %p323_p2 = scmp.ne.s32.totalorder %s510_s2, %s322_s19  ;;  %s45_s15 = int_to_ptr.vmem [resolvable:$true] %s44_s15 }
  0x26   :  { %p326_p3 = scmp.lt.u32.totalorder %s322_s19, %s510_s2 }
  0x28   :  { %p328_p4 = pnand %p326_p3, %p323_p2 }
  0x2a   :  { %331 = shalt.err (!%p328_p4)
}
  0x2b   :  { %s332_s24 = scalar_lea.vmem %s45_s15, 16  ;;  %s336_s0 = scalar_lea.vmem %s45_s15, 32 }
  0x2c   :  { %p333_p5 = scmp.ne.s32.totalorder %s45_s15, %s332_s24  ;;  %p337_p6 = scmp.lt.s32.totalorder %s45_s15, %s45_s15 }
  0x2d   :  { %p338_p7 = scmp.lt.s32.totalorder %s336_s0, %s332_s24 }
  0x2f   :  { %p339_p8 = por %p338_p7, %p337_p6 }
  0x31   :  { %p340_p9 = pnand %p339_p8, %p333_p5 }
  0x33   :  { %343 = shalt.err (!%p340_p9)
}
  0x34   :  { %47 = dma.hbm_to_vmem [thread:$0]  %s510_s2, 16, %s45_s15, [#allocation6]  }
  0x35   :  { %388 = dma.done.wait [#allocation3], 256  }
  0x36   :  { %389 = vsyncadd [#allocation3], 4294967040 }
  0x37   :  { %390 = dma.done.wait [#allocation6], 528  }
  0x38   :  { %391 = vsyncadd [#allocation6], 4294966768  ;;  %vm61_vm0 = vcmask 261120   ;;  %v68_v0 = vld [vmem:[#allocation5] sm:$0xff]  ;;  %v69_v1 = vld [vmem:[#allocation5 + $0x8] sm:$0xff]  ;;  %s401_s2 = smov [#allocation8]  }
  0x39   :  { %v70_v2 = vld [vmem:[#allocation5 + $0x10] sm:$0xff]  ;;  %v259_v3 = vpack.c.bf16 %v69_v1, %v68_v0  ;;  %v71_v4 = vld [vmem:[#allocation5 + $0x18] sm:$0xff]  ;;  %v241_v18 = vld [vmem:[#allocation7] ss:$0 sm:$0xff]  ;;  %s212_s26 = sshll.u32 %s401_s2, 4  ;;  %s213_s26 = int_to_ptr.vmem [resolvable:$true] %s212_s26 }
  0x3a   :  { %v57_v5 = vld [vmem:[#allocation2] sm:$0xff]  ;;  %v58_v6 = vld [vmem:[#allocation2 + $0x8] sm:$0xff]  ;;  %v263_v7 = vpack.c.bf16 %v71_v4, %v70_v2  ;;  %s344_s29 = scalar_lea.vmem %s213_s26, 256  ;;  %p349_p11 = scmp.lt.s32.totalorder %s213_s26, %s213_s26 }
  0x3b   :  { %v59_v8 = vmul.f32 %v57_v5, %v57_v5  ;;  %256 = vmatprep.mubr.msk.f32.mxu0 %vm61_vm0, %v57_v5  ;;  %v60_v9 = vmul.f32 %v58_v6, %v58_v6  ;;  %260 = vmatprep.subr.bf16.mxu0 %v259_v3  ;;  %p345_p10 = scmp.ne.s32.totalorder %s213_s26, %s344_s29  ;;  %p350_p12 = scmp.lt.s32.totalorder %s344_s29, %s344_s29 }
  0x3c   :  { %262 = vmatpush3.bf16.msra.mxu0 %v259_v3 }
  0x3d   :  { %v62_v10 = vsel %vm61_vm0, %v59_v8, 0.0  ;;  %264 = vmatprep.subr.bf16.mxu0 %v263_v7  ;;  %v65_v11 = vsel %vm61_vm0, %v60_v9, 0.0  ;;  %p351_p13 = por %p350_p12, %p349_p11 }
  0x3e   :  { %63 = vadd.xlane.f32.xlu0 %v62_v10 }
  0x3f   :  { %p352_p0 = pnand %p351_p13, %p345_p10 }
  0x40   :  { %266 = vmatpush3.bf16.msra.mxu0 %v263_v7 }
  0x42   :  { %66 = vadd.xlane.f32.xlu0 %v65_v11 }
  0x43   :  { %257 = vmatmul.mubr.msk.f32.vlgmr.msra.gmra.mrb[0].mxu0 %vm61_vm0, %v58_v6 }
  0xcb   :  { %v64_v12 = vpop.xlane.xlu0 %63 }
  0xcf   :  { %v67_v14 = vpop.xlane.xlu0 %66 }
 0x116   :  { %v258_v13 = vpop.f32.mrb[0].mxu0 }
 0x117   :  { %v154_v15 = vmul.f32 2.0, %v258_v13  ;;  %v144_v16 = vpop.f32.mrb[1].mxu0 }
 0x118   :  { %v153_v17 = vmul.f32 2.0, %v144_v16 }
 0x119   :  { %v156_v19 = vsub.f32 %v154_v15, %v67_v14 }
 0x11a   :  { %v155_v20 = vsub.f32 %v153_v17, %v64_v12 }
 0x11b   :  { %v165_v21 = vsub.f32 %v156_v19, %v241_v18 }
 0x11c   :  { %v164_v22 = vsub.f32 %v155_v20, %v241_v18 }
 0x11d   :  { %v167_v23 = vsub.f32 0.0, %v165_v21 }
 0x11e   :  { %188 = vmax.index.xlane.f32.xlu1 %v164_v22  ;;  %v166_v24 = vsub.f32 0.0, %v164_v22 }
 0x11f   :  { %v169_v25 = vmax.f32 %v167_v23, 0.0 }
 0x120   :  { %v168_v26 = vmax.f32 %v166_v24, 0.0 }
 0x121   :  { %274 = vrsqrt.f32 %v169_v25  ;;  %vm179_vm1 = vcmp.eq.f32.partialorder %v169_v25, inf  ;;  %v182_v31 = vand.u32 2147483648, %v169_v25  ;;  %vm181_vm3 = vcmp.eq.f32.partialorder %v169_v25, 0.0 }
 0x122   :  { %276 = vrsqrt.f32 %v168_v26  ;;  %190 = vmax.index.xlane.f32.xlu1 %v165_v21  ;;  %vm172_vm2 = vcmp.eq.f32.partialorder %v168_v26, inf  ;;  %v175_v32 = vand.u32 2147483648, %v168_v26  ;;  %vm174_vm4 = vcmp.eq.f32.partialorder %v168_v26, 0.0 }
 0x12b   :  { %v275_v27 = vpop.eup %274 }
 0x12c   :  { %v277_v28 = vpop.eup %276  ;;  %v178_v29 = vmul.f32 %v275_v27, %v169_v25 }
 0x12d   :  { %v171_v30 = vmul.f32 %v277_v28, %v168_v26 }
 0x12e   :  { %v180_v33 = vsel %vm179_vm1, %v169_v25, %v178_v29 }
 0x12f   :  { %v173_v34 = vsel %vm172_vm2, %v168_v26, %v171_v30  ;;  %v183_v35 = vsel %vm181_vm3, %v182_v31, %v180_v33 }
 0x130   :  { %v176_v36 = vsel %vm174_vm4, %v175_v32, %v173_v34  ;;  %v185_v37 = vsub.f32 0.0, %v183_v35 }
 0x131   :  { %v184_v38 = vsub.f32 0.0, %v176_v36 }
 0x132   :  { %187 = vst [vmem:[#allocation8 + $0x8] sm:$0xff] %v185_v37 }
 0x133   :  { %186 = vst [vmem:[#allocation8] sm:$0xff] %v184_v38 }
 0x134   :  { %355 = shalt.err (!%p352_p0)
}
 0x135   :  { %s356_s6 = scalar_lea.hbm %s511_s3, 256 }
 0x136   :  { %p357_p1 = scmp.ne.s32.totalorder %s511_s3, %s356_s6  ;;  %p360_p2 = scmp.lt.u32.totalorder %s356_s6, %s511_s3 }
 0x138   :  { %p362_p3 = pnand %p360_p2, %p357_p1 }
 0x13a   :  { %365 = shalt.err (!%p362_p3)
}
 0x13b   :  { %218 = dma.vmem_to_hbm [thread:$0]  %s213_s26, 256, %s511_s3, [#allocation4], %s398_s27, %s398_s27, %s399_s28   ;;  %v192_v39 = vlaneseq  ;;  %vm203_vm5 = vcmask 130112   ;;  %vm205_vm6 = vcmask 122880  }
 0x13c   :  { %s402_s1 = smov [#allocation9]  }
 0x13d   :  { %v193_v40 = vand.u32 127, %v192_v39  ;;  %v195_v41 = vshrl.u32 %v192_v39, 7  ;;  %s225_s13 = sshll.u32 %s402_s1, 4  ;;  %s226_s13 = int_to_ptr.vmem [resolvable:$true] %s225_s13 }
 0x13e   :  { %s366_s14 = scalar_lea.vmem %s226_s13, 16  ;;  %s370_s3 = scalar_lea.vmem %s226_s13, 32 }
 0x13f   :  { %v198_v42 = vadd.s32 4294967288, %v193_v40  ;;  %v196_v44 = vsub.s32 %v193_v40, %v195_v41  ;;  %p367_p4 = scmp.ne.s32.totalorder %s226_s13, %s366_s14  ;;  %p371_p5 = scmp.lt.s32.totalorder %s226_s13, %s226_s13 }
 0x140   :  { %p372_p6 = scmp.lt.s32.totalorder %s370_s3, %s366_s14 }
 0x141   :  { %v201_v45 = vsub.s32 %v198_v42, %v195_v41 }
 0x142   :  { %p373_p7 = por %p372_p6, %p371_p5 }
 0x144   :  { %p374_p8 = pnand %p373_p7, %p367_p4 }
 0x1ab   :  { %v189_v43 = vpop.xlane.xlu1 %188 }
 0x1ac   :  { %v197_v47 = vrot.slane %v189_v43, %v196_v44 }
 0x1af   :  { %v191_v46 = vpop.xlane.xlu1 %190 }
 0x1b0   :  { %v202_v48 = vrot.slane %v191_v46, %v201_v45 }
 0x1b2   :  { %v204_v49 = vsel %vm203_vm5, %v202_v48, %v197_v47 }
 0x1b3   :  { %206 = vst.msk [vmem:[#allocation9] sm:$0x1] %vm205_vm6, %v204_v49 }
 0x1b4   :  { %377 = shalt.err (!%p374_p8)
}
 0x1b5   :  { %s378_s15 = scalar_lea.hbm %s512_s4, 16 }
 0x1b6   :  { %p379_p9 = scmp.ne.s32.totalorder %s512_s4, %s378_s15  ;;  %p382_p10 = scmp.lt.u32.totalorder %s378_s15, %s512_s4 }
 0x1b8   :  { %p384_p11 = pnand %p382_p10, %p379_p9 }
 0x1ba   :  { %387 = shalt.err (!%p384_p11)
}
 0x1bb   :  { %228 = dma.vmem_to_hbm [thread:$0]  %s226_s13, 16, %s512_s4, [#allocation10]  }
 0x1bc   :  { %392 = dma.done.wait [#allocation4], 256  }
 0x1bd   :  { %393 = vsyncadd [#allocation4], 4294967040 }
 0x1be   :  { %394 = dma.done.wait [#allocation10], 16  }
 0x1bf   :  { %395 = vsyncadd [#allocation10], 4294967280 }
 0x1c0   :  { %235 = vsyncpa [#allocation3], 1 }
 0x1c1   :  { %236 = vsyncpa [#allocation6], 1 }
 0x1c2   :  { %237 = vsyncpa [#allocation4], 1 }
 0x1c3   :  { %238 = vsyncpa [#allocation10], 1 }

</bundles_post_ra>
